<compile_context>
chip_gen: v6e
topology: v6e:2x2x1
jax: 0.10.0
libtpu: 0.0.40
codegen_flags: <defaults>
</compile_context>

<pallas_src>
import functools
import math

import jax
import jax.numpy as jnp
from jax import lax
from jax.experimental import pallas as pl
from jax.experimental.pallas import tpu as pltpu


def _round_up(x, m):
    return ((x + m - 1) // m) * m


# ----------------------------------------------------------------------------
# Pallas kernel: tiled linear  y = x @ w + b   (K-tiled with f32 accumulator)
#   x tile (tn, tk) bf16, w tile (tk, tp) bf16, bias (1, tp) f32 -> (tn, tp)
# Used for both the hoisted LSTM input projection and the decoder.
# ----------------------------------------------------------------------------
def linear_kernel(x_ref, w_ref, b_ref, o_ref, acc_ref):
    k = pl.program_id(2)

    @pl.when(k == 0)
    def _():
        acc_ref[...] = jnp.zeros_like(acc_ref)

    acc_ref[...] += jnp.dot(x_ref[...], w_ref[...],
                            preferred_element_type=jnp.float32)

    @pl.when(k == pl.num_programs(2) - 1)
    def _():
        o_ref[...] = (acc_ref[...] + b_ref[...]).astype(o_ref.dtype)


def linear(x2d, w_t, b, *, out_dtype=jnp.float32, tn=512, tp=512, tk_max=2048):
    """x2d: (N, K); w_t: (K, P); b: (1, P). Returns (N, P) out_dtype."""
    N, K = x2d.shape
    P = w_t.shape[1]

    tn = min(tn, _round_up(N, 8))
    tp = min(tp, _round_up(P, 128))
    if K > tk_max:
        tk = tk_max
        Kp = _round_up(K, tk)
    else:
        tk = K
        Kp = K
    Np = _round_up(N, tn)
    Pp = _round_up(P, tp)

    xp = x2d.astype(jnp.bfloat16)
    wp = w_t.astype(jnp.bfloat16)
    bp = b.astype(jnp.float32)
    if (Np, Kp) != (N, K):
        xp = jnp.pad(xp, ((0, Np - N), (0, Kp - K)))
    if (Kp, Pp) != (K, P):
        wp = jnp.pad(wp, ((0, Kp - K), (0, Pp - P)))
    if Pp != P:
        bp = jnp.pad(bp, ((0, 0), (0, Pp - P)))

    ni, nj, nk = Np // tn, Pp // tp, Kp // tk
    x_bytes = Np * Kp * 2
    w_bytes = Kp * Pp * 2
    # Streaming heuristic: pick the loop order so the larger operand is fetched
    # ~once and the smaller one re-streams (fixes decoder-weight re-streaming).
    cols_outer = (w_bytes + nj * x_bytes) < (x_bytes + ni * w_bytes)

    if cols_outer:
        grid = (nj, ni, nk)
        x_map = lambda j, i, k: (i, k)
        w_map = lambda j, i, k: (k, j)
        b_map = lambda j, i, k: (0, j)
        o_map = lambda j, i, k: (i, j)
    else:
        grid = (ni, nj, nk)
        x_map = lambda i, j, k: (i, k)
        w_map = lambda i, j, k: (k, j)
        b_map = lambda i, j, k: (0, j)
        o_map = lambda i, j, k: (i, j)

    out = pl.pallas_call(
        linear_kernel,
        out_shape=jax.ShapeDtypeStruct((Np, Pp), out_dtype),
        grid=grid,
        in_specs=[pl.BlockSpec((tn, tk), x_map),
                  pl.BlockSpec((tk, tp), w_map),
                  pl.BlockSpec((1, tp), b_map)],
        out_specs=pl.BlockSpec((tn, tp), o_map),
        scratch_shapes=[pltpu.VMEM((tn, tp), jnp.float32)],
        compiler_params=pltpu.CompilerParams(
            dimension_semantics=("parallel", "parallel", "arbitrary"),
            vmem_limit_bytes=64 * 1024 * 1024),
    )(xp, wp, bp)
    return out[:N, :P]


# ----------------------------------------------------------------------------
# Pallas kernel: one LSTM layer over a (batch tile, time chunk) grid.
# Inputs:
#   pg_ref : (T, tb, 4H) bf16  pre-gates = x_t @ W_ih + (b_ih + b_hh), hoisted,
#                              gate order permuted to (i, f, o, g)
#   h0/c0  : (tb, H) f32       initial state (used only at time chunk 0)
#   whh    : (H, 4H) bf16      recurrent weight (pre-transposed + permuted)
# Outputs:
#   y_ref  : (T, tb, H) bf16   hidden sequence for this chunk
#   hf/cf  : (tb, H) f32       resident recurrent state (constant across time)
# ----------------------------------------------------------------------------
def lstm_seq_kernel(pg_ref, h0_ref, c0_ref, whh_ref, y_ref, hf_ref, cf_ref,
                    *, seq_len, mask_tail):
    t_chunk = pl.program_id(1)

    @pl.when(t_chunk == 0)
    def _():
        hf_ref[...] = h0_ref[...]
        cf_ref[...] = c0_ref[...]

    whh = whh_ref[...]                      # (H, 4H) bf16, read once per chunk
    H = hf_ref.shape[-1]
    T = pg_ref.shape[0]

    def step(t, carry):
        h, c = carry                        # f32 carry
        gates = pg_ref[t].astype(jnp.float32) + jnp.dot(
            h.astype(whh.dtype), whh, preferred_element_type=jnp.float32)
        sg = jax.nn.sigmoid(gates[:, :3 * H])     # contiguous (i, f, o) slab
        i_g = sg[:, 0:H]
        f_g = sg[:, H:2 * H]
        o_g = sg[:, 2 * H:3 * H]
        g_g = jnp.tanh(gates[:, 3 * H:])
        c_new = f_g * c + i_g * g_g
        h_new = o_g * jnp.tanh(c_new)
        if mask_tail:                       # static: only when S was padded
            valid = (t_chunk * T + t) < seq_len
            h_new = jnp.where(valid, h_new, h)
            c_new = jnp.where(valid, c_new, c)
        y_ref[t] = h_new.astype(y_ref.dtype)
        return (h_new, c_new)

    h_fin, c_fin = lax.fori_loop(0, T, step, (hf_ref[...], cf_ref[...]),
                                 unroll=min(8, T))
    hf_ref[...] = h_fin
    cf_ref[...] = c_fin


def _choose_time_chunk(S, tb, H, *, budget_bytes=24 * 1024 * 1024,
                       max_chunk=128):
    """Largest time chunk whose double-buffered bf16 pg+y blocks fit budget."""
    per_t = 2 * (tb * 4 * H * 2 + tb * H * 2)     # pg + y, bf16, double-buffered
    return int(max(1, min(S, max_chunk, budget_bytes // per_t)))


def lstm_layer(pre_gates, h0, c0, w_hh_t):
    """pre_gates: (S, B, 4H); returns (y (S,B,H) bf16, h_final f32, c_final f32)."""
    S, B, G = pre_gates.shape
    H = h0.shape[-1]
    assert G == 4 * H

    Bp = _round_up(B, 8)
    if Bp != B:
        pre_gates = jnp.pad(pre_gates, ((0, 0), (0, Bp - B), (0, 0)))
        h0 = jnp.pad(h0, ((0, Bp - B), (0, 0)))
        c0 = jnp.pad(c0, ((0, Bp - B), (0, 0)))

    # Batch tile: split across TensorCores (v7x megacore) when big enough.
    tb = Bp // 2 if (Bp >= 16 and (Bp // 2) % 8 == 0) else Bp
    nb = Bp // tb

    chunk_t = _choose_time_chunk(S, tb, H)
    Sp = _round_up(S, chunk_t)
    if Sp != S:
        pre_gates = jnp.pad(pre_gates, ((0, Sp - S), (0, 0), (0, 0)))
    n_chunks = Sp // chunk_t

    pre_gates = pre_gates.astype(jnp.bfloat16)
    h0 = h0.astype(jnp.float32)
    c0 = c0.astype(jnp.float32)
    whh = w_hh_t.astype(jnp.bfloat16)

    vmem_est = (2 * chunk_t * (tb * 4 * H + tb * H) * 2   # pg + y chunk blocks
                + 2 * H * 4 * H * 2                       # whh (double-buffered)
                + 8 * tb * H * 4                          # h0/c0/hf/cf buffers
                + (4 << 20))                              # margin
    vmem_limit = int(min(max(vmem_est, 32 << 20), 64 << 20))

    kernel = functools.partial(lstm_seq_kernel, seq_len=S, mask_tail=(Sp != S))

    y, hf, cf = pl.pallas_call(
        kernel,
        out_shape=(jax.ShapeDtypeStruct((Sp, Bp, H), jnp.bfloat16),
                   jax.ShapeDtypeStruct((Bp, H), jnp.float32),
                   jax.ShapeDtypeStruct((Bp, H), jnp.float32)),
        grid=(nb, n_chunks),
        in_specs=[pl.BlockSpec((chunk_t, tb, 4 * H), lambda b, t: (t, b, 0)),
                  pl.BlockSpec((tb, H), lambda b, t: (b, 0)),
                  pl.BlockSpec((tb, H), lambda b, t: (b, 0)),
                  # TODO(synk): pipeline_mode=pl.Buffered(1) (or a one-shot
                  # make_async_copy into VMEM scratch) would avoid
                  # double-buffering this constant-index weight on v7x.
                  pl.BlockSpec((H, 4 * H), lambda b, t: (0, 0))],
        out_specs=(pl.BlockSpec((chunk_t, tb, H), lambda b, t: (t, b, 0)),
                   pl.BlockSpec((tb, H), lambda b, t: (b, 0)),
                   pl.BlockSpec((tb, H), lambda b, t: (b, 0))),
        compiler_params=pltpu.CompilerParams(
            dimension_semantics=("parallel", "arbitrary"),
            vmem_limit_bytes=vmem_limit),
    )(pre_gates, h0, c0, whh)
    return y[:S, :B, :], hf[:B], cf[:B]


# ----------------------------------------------------------------------------
# Model wrapper
# ----------------------------------------------------------------------------
class RNNLanguageModelPallas:
    def __init__(self, vocab_size, seq_length, embedding_size, encoding_size,
                 num_layers, dropout_prob, key):
        self.vocab_size = vocab_size
        self.seq_length = seq_length
        self.embedding_size = embedding_size
        self.encoding_size = encoding_size
        self.num_layers = num_layers
        self.dropout_prob = dropout_prob  # eval mode: dropout is identity

        keys = jax.random.split(key, 2 + 4 * num_layers)
        initrange = 0.1
        # embedding weight (V, E), uniform(-0.1, 0.1) (matches init_weights when tied)
        emb_f32 = jax.random.uniform(keys[0], (vocab_size, embedding_size),
                                     jnp.float32, -initrange, initrange)
        self.emb_w = emb_f32.astype(jnp.bfloat16)

        H = encoding_size
        kscale = 1.0 / math.sqrt(H)
        # Gate permutation: PyTorch order (i, f, g, o) -> kernel order (i, f, o, g)
        perm = jnp.concatenate([jnp.arange(0, H), jnp.arange(H, 2 * H),
                                jnp.arange(3 * H, 4 * H),
                                jnp.arange(2 * H, 3 * H)])
        self.lstm_params = []
        for l in range(num_layers):
            in_size = embedding_size if l == 0 else H
            kw = keys[2 + 4 * l: 2 + 4 * (l + 1)]
            w_ih = jax.random.uniform(kw[0], (4 * H, in_size), jnp.float32,
                                      -kscale, kscale)
            w_hh = jax.random.uniform(kw[1], (4 * H, H), jnp.float32,
                                      -kscale, kscale)
            b_ih = jax.random.uniform(kw[2], (4 * H,), jnp.float32,
                                      -kscale, kscale)
            b_hh = jax.random.uniform(kw[3], (4 * H,), jnp.float32,
                                      -kscale, kscale)
            w_ih_t = jnp.transpose(w_ih)[:, perm].astype(jnp.bfloat16)  # (in, 4H)
            w_hh_t = jnp.transpose(w_hh)[:, perm].astype(jnp.bfloat16)  # (H, 4H)
            bias = (b_ih + b_hh)[perm].reshape(1, 4 * H).astype(jnp.float32)
            self.lstm_params.append((w_ih_t, w_hh_t, bias))

        # decoder: weight tying when embedding_size == encoding_size
        if embedding_size == encoding_size:
            dec_w = emb_f32                                    # (V, H), tied
        else:
            dec_w = jax.random.uniform(keys[1], (vocab_size, encoding_size),
                                       jnp.float32, -initrange, initrange)
        self.dec_w_t = jnp.transpose(dec_w).astype(jnp.bfloat16)   # (H, V)
        self.dec_b = jnp.zeros((1, vocab_size), jnp.float32)       # zero bias

    def init_state(self, batch_size):
        H = self.encoding_size
        h = jnp.zeros((self.num_layers, batch_size, H), jnp.float32)
        c = jnp.zeros((self.num_layers, batch_size, H), jnp.float32)
        return (h, c)

    def __call__(self, tokens, hidden):
        """tokens: (S, B) int32; hidden: (h, c) each (L, B, H)."""
        h0_all, c0_all = hidden
        # TODO(synk): embedding gather kept in plain JAX; could be fused into the
        # input-projection kernel via PrefetchScalarGridSpec row gather.
        x = jnp.take(self.emb_w, tokens, axis=0)      # (S, B, E) bf16
        # TODO(synk): dropout skipped (eval-mode identity; PyTorch applies it in train only)
        S, B, _ = x.shape
        H = self.encoding_size

        h_finals, c_finals = [], []
        for l in range(self.num_layers):
            w_ih_t, w_hh_t, b = self.lstm_params[l]
            # Hoisted input projection: one big (S*B, E_in) @ (E_in, 4H) + bias,
            # emitted in bf16 to halve pre-gate HBM traffic.
            pre = linear(x.reshape(S * B, x.shape[-1]), w_ih_t, b,
                         out_dtype=jnp.bfloat16)
            pre = pre.reshape(S, B, 4 * H)
            x, hf, cf = lstm_layer(pre, h0_all[l], c0_all[l], w_hh_t)
            h_finals.append(hf)
            c_finals.append(cf)

        # TODO(synk): the last layer's (S,B,H) output round-trips HBM before the
        # decoder; fusing it into the decoder matmul would save one write+read.
        encoding = x                                  # (S, B, H) bf16
        decoded = linear(encoding.reshape(S * B, H), self.dec_w_t, self.dec_b,
                         out_dtype=jnp.float32)
        logits = decoded.reshape(S, B, self.vocab_size)
        new_hidden = (jnp.stack(h_finals, axis=0), jnp.stack(c_finals, axis=0))
        return logits, new_hidden


if __name__ == "__main__":
    vocab_size = 64
    seq_length = 8
    embedding_size = 32
    encoding_size = 32
    num_layers = 2
    dropout_prob = 0.1
    batch_size = 2

    key = jax.random.PRNGKey(0)
    k_model, k_tok = jax.random.split(key)

    model = RNNLanguageModelPallas(vocab_size, seq_length, embedding_size,
                                   encoding_size, num_layers, dropout_prob,
                                   k_model)

    tokens = jax.random.randint(k_tok, (seq_length, batch_size), 0, vocab_size,
                                dtype=jnp.int32)
    hidden = model.init_state(batch_size)

    logits, new_hidden = model(tokens, hidden)
    jax.block_until_ready(logits)
    jax.block_until_ready(new_hidden)

    assert logits.shape == (seq_length, batch_size, vocab_size)
    assert logits.dtype == jnp.float32
    assert new_hidden[0].shape == (num_layers, batch_size, encoding_size)
    assert new_hidden[1].shape == (num_layers, batch_size, encoding_size)
    assert bool(jnp.all(jnp.isfinite(logits)))
    print("KERNEL_OK")
</pallas_src>

<mosaic_0001>
module attributes {stable_mosaic.version = 11 : i64} {
  func.func @linear_kernel(%arg0: i32, %arg1: i32, %arg2: i32, %arg3: memref<16x32xbf16, #tpu.memory_space<vmem>>, %arg4: memref<32x128xbf16, #tpu.memory_space<vmem>>, %arg5: memref<1x128xf32, #tpu.memory_space<vmem>>, %arg6: memref<16x128xbf16, #tpu.memory_space<vmem>>, %arg7: memref<16x128xf32, #tpu.memory_space<vmem>>) attributes {dimension_semantics = [#tpu.dimension_semantics<parallel>, #tpu.dimension_semantics<parallel>, #tpu.dimension_semantics<arbitrary>], iteration_bounds = array<i64: 1, 1, 1>, scalar_prefetch = 0 : i64, scratch_operands = 1 : i64, tpu.core_type = #tpu.core_type<tc>, window_params = [{transform_indices = @transform_0, window_bounds = array<i64: 16, 32>}, {transform_indices = @transform_1, window_bounds = array<i64: 32, 128>}, {transform_indices = @transform_2, window_bounds = array<i64: 1, 128>}, {transform_indices = @transform_3, window_bounds = array<i64: 16, 128>}]} {
    %c0_i32 = arith.constant 0 : i32
    %0 = arith.cmpi eq, %arg2, %c0_i32 : i32
    %1 = arith.extui %0 : i1 to i32
    %c0_i32_0 = arith.constant 0 : i32
    %2 = arith.cmpi ne, %1, %c0_i32_0 : i32
    scf.if %2 {
      %cst_10 = arith.constant 0.000000e+00 : f32
      %12 = vector.broadcast %cst_10 : f32 to vector<16x128xf32>
      %c0_11 = arith.constant 0 : index
      %c0_12 = arith.constant 0 : index
      %13 = vector.load %arg7[%c0_11, %c0_12] : memref<16x128xf32, #tpu.memory_space<vmem>>, vector<16x128xf32>
      tpu.vector_store %arg7[%c0_11, %c0_12], %12 {strides = array<i32>} : memref<16x128xf32, #tpu.memory_space<vmem>>, vector<16x128xf32>,
    } else {
    }
    %c0 = arith.constant 0 : index
    %c0_1 = arith.constant 0 : index
    %3 = vector.load %arg7[%c0, %c0_1] : memref<16x128xf32, #tpu.memory_space<vmem>>, vector<16x128xf32>
    %c0_2 = arith.constant 0 : index
    %c0_3 = arith.constant 0 : index
    %4 = vector.load %arg3[%c0_2, %c0_3] : memref<16x32xbf16, #tpu.memory_space<vmem>>, vector<16x32xbf16>
    %c0_4 = arith.constant 0 : index
    %c0_5 = arith.constant 0 : index
    %5 = vector.load %arg4[%c0_4, %c0_5] : memref<32x128xbf16, #tpu.memory_space<vmem>>, vector<32x128xbf16>
    %cst = arith.constant dense<0.000000e+00> : vector<16x128xf32>
    %6 = tpu.matmul %4, %5, %cst {dimension_numbers = #tpu.dot_dimension_numbers<[1], [0], [0], [1], [0, 0, 1, 1], [], []>} : vector<16x32xbf16>, vector<32x128xbf16>, vector<16x128xf32> -> vector<16x128xf32>
    %7 = arith.addf %3, %6 : vector<16x128xf32>
    %c0_6 = arith.constant 0 : index
    %c0_7 = arith.constant 0 : index
    %8 = vector.load %arg7[%c0_6, %c0_7] : memref<16x128xf32, #tpu.memory_space<vmem>>, vector<16x128xf32>
    tpu.vector_store %arg7[%c0_6, %c0_7], %7 {strides = array<i32>} : memref<16x128xf32, #tpu.memory_space<vmem>>, vector<16x128xf32>,
    %c0_i32_8 = arith.constant 0 : i32
    %9 = arith.cmpi eq, %arg2, %c0_i32_8 : i32
    %10 = arith.extui %9 : i1 to i32
    %c0_i32_9 = arith.constant 0 : i32
    %11 = arith.cmpi ne, %10, %c0_i32_9 : i32
    scf.if %11 {
      %c0_10 = arith.constant 0 : index
      %c0_11 = arith.constant 0 : index
      %12 = vector.load %arg7[%c0_10, %c0_11] : memref<16x128xf32, #tpu.memory_space<vmem>>, vector<16x128xf32>
      %c0_12 = arith.constant 0 : index
      %c0_13 = arith.constant 0 : index
      %13 = vector.load %arg5[%c0_12, %c0_13] : memref<1x128xf32, #tpu.memory_space<vmem>>, vector<1x128xf32>
      %14 = vector.broadcast %13 : vector<1x128xf32> to vector<16x128xf32>
      %15 = arith.addf %12, %14 : vector<16x128xf32>
      %16 = arith.truncf %15 : vector<16x128xf32> to vector<16x128xbf16>
      %c0_14 = arith.constant 0 : index
      %c0_15 = arith.constant 0 : index
      %17 = vector.load %arg6[%c0_14, %c0_15] : memref<16x128xbf16, #tpu.memory_space<vmem>>, vector<16x128xbf16>
      tpu.vector_store %arg6[%c0_14, %c0_15], %16 {strides = array<i32>} : memref<16x128xbf16, #tpu.memory_space<vmem>>, vector<16x128xbf16>,
    } else {
    }
    return
  }
  func.func @transform_0(%arg0: i32, %arg1: i32, %arg2: i32) -> (i32, i32) {
    %c0_i32 = arith.constant 0 : i32
    return %arg0, %arg2 : i32, i32
  }
  func.func @transform_1(%arg0: i32, %arg1: i32, %arg2: i32) -> (i32, i32) {
    %c0_i32 = arith.constant 0 : i32
    return %arg2, %arg1 : i32, i32
  }
  func.func @transform_2(%arg0: i32, %arg1: i32, %arg2: i32) -> (i32, i32) {
    %c0_i32 = arith.constant 0 : i32
    %c0_i32_0 = arith.constant 0 : i32
    return %c0_i32, %arg1 : i32, i32
  }
  func.func @transform_3(%arg0: i32, %arg1: i32, %arg2: i32) -> (i32, i32) {
    %c0_i32 = arith.constant 0 : i32
    return %arg0, %arg1 : i32, i32
  }
}

</mosaic_0001>

<bundles_post_ra>
// kernel: tpu_custom_call.1
= control target key start
LH: loop header
LB: loop body
LE: loop exit
PB: predicated region body
PF: predicated region fallthrough
CT: control target
= control target key end

     0   :  { %8 = vsyncpa [#allocation4], 0  ;;  %s315_s0 = inlined_call_operand.hbm [shape: bf16[16,32], index: 0, kind: input, shape index: {}]   ;;  %s316_s1 = inlined_call_operand.hbm [shape: bf16[32,128], index: 1, kind: input, shape index: {}]   ;;  %s317_s2 = inlined_call_operand.vmem [shape: f32[1,128], index: 2, kind: input, shape index: {}]   ;;  %s318_s3 = inlined_call_operand.hbm [shape: bf16[16,128], index: 3, kind: output, shape index: {}]  }
   0x1   :  { %9 = vsyncpa [#allocation7], 0 }
   0x2   :  { %10 = vsyncpa [#allocation5], 0  ;;  %s267_s12 = smov [#allocation3]  }
   0x3   :  { %s16_s13 = sshll.u32 %s267_s12, 4  ;;  %s17_s13 = int_to_ptr.vmem [resolvable:$true] %s16_s13 }
   0x4   :  { %s209_s14 = scalar_lea.vmem %s17_s13, 128  ;;  %p214_p1 = scmp.lt.s32.totalorder %s17_s13, %s17_s13 }
   0x5   :  { %p210_p0 = scmp.ne.s32.totalorder %s17_s13, %s209_s14  ;;  %p215_p2 = scmp.lt.s32.totalorder %s209_s14, %s209_s14 }
   0x7   :  { %p216_p3 = por %p215_p2, %p214_p1 }
   0x9   :  { %p217_p4 = pnand %p216_p3, %p210_p0 }
   0xb   :  { %220 = shalt.err (!%p217_p4)
}
   0xc   :  { %s268_s15 = smov 64   ;;  %s269_s16 = smov 4  }
   0xd   :  { %22 = dma.hbm_to_vmem [thread:$0]  %s315_s0, 128, %s17_s13, [#allocation4], %s268_s15, %s268_s15, %s269_s16  }
   0xe   :  { %s270_s19 = smov [#allocation6]  }
   0xf   :  { %s28_s20 = sshll.u32 %s270_s19, 4  ;;  %s29_s20 = int_to_ptr.vmem [resolvable:$true] %s28_s20 }
  0x10   :  { %s229_s21 = scalar_lea.vmem %s29_s20, 256  ;;  %p234_p6 = scmp.lt.s32.totalorder %s29_s20, %s29_s20 }
  0x11   :  { %p230_p5 = scmp.ne.s32.totalorder %s29_s20, %s229_s21  ;;  %p235_p7 = scmp.lt.s32.totalorder %s229_s21, %s229_s21 }
  0x13   :  { %p236_p8 = por %p235_p7, %p234_p6 }
  0x15   :  { %p237_p9 = pnand %p236_p8, %p230_p5 }
  0x17   :  { %240 = shalt.err (!%p237_p9)
}
  0x18   :  { %34 = dma.hbm_to_vmem [thread:$0]  %s316_s1, 256, %s29_s20, [#allocation7], %s268_s15, %s268_s15, %s269_s16  }
  0x19   :  { %261 = dma.done.wait [#allocation4], 128  }
  0x1a   :  { %262 = vsyncadd [#allocation4], 4294967168 }
  0x1b   :  { %263 = dma.done.wait [#allocation7], 256  }
  0x1c   :  { %264 = vsyncadd [#allocation7], 4294967040  ;;  %v271_v0 = vmov 0.0   ;;  %vm272_vm0 = vmmov 0   ;;  %v198_v1 = vld [vmem:[#allocation6 + $0x8] sm:$0xff]   ;;  %v199_v2 = vld [vmem:[#allocation6] sm:$0xff]  }
  0x1d   :  { %183 = vmatprep.subr.bf16.mxu0 %v271_v0  ;;  %187 = vmatprep.mubr.msk.bf16.mxu0 %vm272_vm0, %v271_v0  ;;  %v200_v3 = vld [vmem:[#allocation3] sm:$0xff]   ;;  %vm75_vm1 = vcmask 261120   ;;  %s273_s1 = smov [#allocation8]  }
  0x1e   :  { %184 = vmatpush3.bf16.msra.mxu0 %v198_v1  ;;  %v170_v5 = vld [vmem:[%s317_s2] ss:$0 sm:$0xff]  ;;  %s153_s25 = sshll.u32 %s273_s1, 4  ;;  %s154_s25 = int_to_ptr.vmem [resolvable:$true] %s153_s25 }
  0x1f   :  { %185 = vmatprep.subr.bf16.mxu0 %v271_v0  ;;  %s241_s26 = scalar_lea.vmem %s154_s25, 128  ;;  %p246_p11 = scmp.lt.s32.totalorder %s154_s25, %s154_s25 }
  0x20   :  { %p242_p10 = scmp.ne.s32.totalorder %s154_s25, %s241_s26  ;;  %p247_p12 = scmp.lt.s32.totalorder %s241_s26, %s241_s26 }
  0x22   :  { %186 = vmatpush3.bf16.msra.mxu0 %v199_v2  ;;  %p248_p13 = por %p247_p12, %p246_p11 }
  0x24   :  { %p249_p0 = pnand %p248_p13, %p242_p10 }
  0x25   :  { %188 = vmatmul.mubr.msk.bf16.vlgmr.msra.gmra.mxu0 %vm75_vm1, %v200_v3 }
  0xe5   :  { %v113_v4 = vpop.f32.mrf.mxu0 }
  0xe6   :  { %v136_v8 = vadd.f32 %v170_v5, %v113_v4 }
  0xe7   :  { %v189_v6 = vpop.f32.mrf.mxu0 }
  0xe9   :  { %v116_v7 = vpop.f32.mrf.mxu0 }
  0xea   :  { %v137_v9 = vadd.f32 %v170_v5, %v116_v7 }
  0xeb   :  { %v190_v10 = vpop.f32.mrf.mxu0 }
  0xec   :  { %v178_v11 = vpack.c.bf16 %v137_v9, %v136_v8 }
  0xee   :  { %179 = vst [vmem:[#allocation8] sm:$0xff] %v178_v11  }
  0xef   :  { %252 = shalt.err (!%p249_p0)
}
  0xf0   :  { %159 = dma.vmem_to_hbm [thread:$0]  %s154_s25, 128, %s318_s3, [#allocation5], %s268_s15, %s268_s15, %s269_s16  }
  0xf1   :  { %265 = dma.done.wait [#allocation5], 128  }
  0xf2   :  { %266 = vsyncadd [#allocation5], 4294967168 }
  0xf3   :  { %163 = vsyncpa [#allocation4], 1 }
  0xf4   :  { %164 = vsyncpa [#allocation7], 1 }
  0xf5   :  { %165 = vsyncpa [#allocation5], 1 }

</bundles_post_ra>
